<compile_context>
chip_gen: v6e
topology: v6e:2x2x1
jax: 0.10.0
libtpu: 0.0.40
codegen_flags: <defaults>
</compile_context>

<pallas_src>
import functools

import jax
import jax.numpy as jnp
from jax import lax
from jax.experimental import pallas as pl
from jax.experimental.pallas import tpu as pltpu


# ----------------------------- configuration --------------------------------
CFG_SHAPE_NET = {
    "input_dim": 2,
    "output_dim": 1,
    "hidden_units": [32, 32],
}
CFG_PARAM_NET = {
    "input_dim": 3,
    "hidden_units": [32, 32],
}


def _round_up(x, m):
    return -(-x // m) * m


def _round_down(x, m):
    return (x // m) * m


def _default_compute_dtype():
    """bf16 tanh chain on v6e/v7x (native bf16 EUP/VPU), f32 elsewhere (v5e...)."""
    try:
        dev = jax.devices()[0]
        if dev.platform != "tpu":
            return jnp.float32
        kind = dev.device_kind.lower()
    except Exception:
        return jnp.float32
    if ("v6" in kind) or ("v7" in kind):
        return jnp.bfloat16
    return jnp.float32


# ------------------------------ kernel body ----------------------------------
def nif_pointwise_kernel(x_ref, *refs, shape_i_dim, param_i_dim, total_units,
                         n_param_layers, n_shape_layers, compute_dtype):
    """Fused NIF pointwise forward for one batch tile (batch on lanes).

    x_ref : (tb, F) input tile, F = shape_i_dim + param_i_dim (original layout).
    refs  : [wb_p0, wb_p1, ..., wb_s0, wb_s1, ..., o_ref]
            wb_* are packed [W | b] arrays of shape (out, in+1);
            o_ref is (shape_o_dim, tb)  (batch on lanes -> lane-dense stores).
    """
    o_ref = refs[-1]
    wbs = refs[:-1]
    cd = compute_dtype

    x = x_ref[...]                                            # (tb, F) f32
    # Contract W's in-dim (axis 1) with x's feature dim (axis 1): W @ x_tile.T
    dn = (((1,), (1,)), ((), ()))

    idx = 0

    # ---------------- parameter network: Linear + tanh after every layer ----
    wb = wbs[idx][...]; idx += 1                              # (out, param_i+1)
    w = wb[:, :param_i_dim]
    b = wb[:, param_i_dim:]
    h = lax.dot_general(w, x[:, shape_i_dim:shape_i_dim + param_i_dim], dn,
                        preferred_element_type=jnp.float32) + b
    h = jnp.tanh(h.astype(cd))                                # (h0, tb) cd
    for _ in range(n_param_layers - 1):
        wb = wbs[idx][...]; idx += 1
        k = wb.shape[1] - 1
        w = wb[:, :k]
        b = wb[:, k:]
        h = jnp.dot(w, h, preferred_element_type=jnp.float32) + b
        h = jnp.tanh(h.astype(cd))
    latent = h                                                # (latent_dim, tb)

    # ---------------- shape network: Linear, * latent slice, tanh ----------
    wb = wbs[idx][...]; idx += 1                              # (out, shape_i+1)
    w = wb[:, :shape_i_dim]
    b = wb[:, shape_i_dim:]
    out = lax.dot_general(w, x[:, :shape_i_dim], dn,
                          preferred_element_type=jnp.float32) + b
    off = 0
    d = total_units[0]
    # sublane slice (offsets 0/32/64 are multiples of 8) -> cheap, no XLU work
    s = jnp.tanh(out.astype(cd) * latent[off:off + d, :])
    off += d
    for li in range(1, n_shape_layers):
        wb = wbs[idx][...]; idx += 1
        k = wb.shape[1] - 1
        w = wb[:, :k]
        b = wb[:, k:]
        out = jnp.dot(w, s, preferred_element_type=jnp.float32) + b
        d = total_units[li]
        s = jnp.tanh(out.astype(cd) * latent[off:off + d, :])
        off += d

    o_ref[...] = s.astype(o_ref.dtype)                        # (shape_o, tb)


# ------------------------------ wrapper --------------------------------------
def nif_pointwise_forward(inputs, param_layers, shape_layers, cfg_shape_net,
                          *, target_tb=1024, compute_dtype=None):
    """inputs: (B, shape_i_dim + param_i_dim) float32 (original layout).

    param_layers / shape_layers: lists of (W, b) with W (out, in), b (out, 1)
    (PyTorch nn.Linear storage convention).  Returns (B, shape_o_dim) float32.
    """
    if compute_dtype is None:
        compute_dtype = _default_compute_dtype()

    B, F = inputs.shape
    shape_i_dim = cfg_shape_net["input_dim"]
    shape_o_dim = cfg_shape_net["output_dim"]
    hidden_units = cfg_shape_net["hidden_units"]
    total_units = tuple(hidden_units) + (shape_o_dim,)
    param_i_dim = F - shape_i_dim

    # --- pick batch tile: big enough to amortize per-step cost, but keep ----
    # --- >=2 grid steps when possible so v7x's two TensorCores both work ----
    b128 = _round_up(B, 128)
    tb = min(_round_up(target_tb, 128), b128)
    if b128 >= 256 and (b128 // tb) < 2:
        tb = max(128, _round_down(b128 // 2, 128))
    n_tiles = -(-B // tb)
    Bp = n_tiles * tb

    x = inputs
    if Bp != B:                                 # pad only when B not a tile multiple
        x = jnp.pad(inputs, ((0, Bp - B), (0, 0)))

    # pack [W | b] per layer -> one constant input per layer (6 instead of 12)
    wb_list = [jnp.concatenate([w, b], axis=1).astype(jnp.float32)
               for (w, b) in list(param_layers) + list(shape_layers)]

    kernel = functools.partial(
        nif_pointwise_kernel,
        shape_i_dim=shape_i_dim,
        param_i_dim=param_i_dim,
        total_units=total_units,
        n_param_layers=len(param_layers),
        n_shape_layers=len(shape_layers),
        compute_dtype=compute_dtype,
    )

    in_specs = [pl.BlockSpec((tb, F), lambda i: (i, 0))]
    for wb in wb_list:
        # full (untiled) packed weight block, constant across the batch grid
        in_specs.append(pl.BlockSpec(wb.shape, lambda i: (0, 0)))

    out_specs = pl.BlockSpec((shape_o_dim, tb), lambda i: (0, i))

    out_t = pl.pallas_call(
        kernel,
        out_shape=jax.ShapeDtypeStruct((shape_o_dim, Bp), jnp.float32),
        grid_spec=pltpu.PrefetchScalarGridSpec(
            num_scalar_prefetch=0,
            grid=(n_tiles,),
            in_specs=in_specs,
            out_specs=out_specs,
        ),
        compiler_params=pltpu.CompilerParams(
            dimension_semantics=("parallel",)),
    )(x, *wb_list)

    return out_t[:, :B].T                                   # (B, shape_o)


# -------------------------- parameter construction ---------------------------
def init_linear(key, in_f, out_f):
    """PyTorch-Linear-like init: U(-1/sqrt(in), 1/sqrt(in)); W (out,in), b (out,1)."""
    kw, kb = jax.random.split(key)
    bound = 1.0 / jnp.sqrt(jnp.float32(in_f))
    w = jax.random.uniform(kw, (out_f, in_f), jnp.float32, -bound, bound)
    b = jax.random.uniform(kb, (out_f, 1), jnp.float32, -bound, bound)
    return w, b


def build_params(key, cfg_shape_net, cfg_param_net):
    shape_i = cfg_shape_net["input_dim"]
    shape_o = cfg_shape_net["output_dim"]
    shape_h = cfg_shape_net["hidden_units"]
    param_i = cfg_param_net["input_dim"]
    param_h = cfg_param_net["hidden_units"]
    latent_dim = sum(shape_h) + shape_o      # keep latent slices sublane-aligned
                                             # (offsets 0/32/64 are multiples of 8)

    keys = jax.random.split(key, 16)
    kidx = 0

    # parameter network: param_i -> param_h[0] -> ... -> latent_dim
    param_dims = [param_i] + list(param_h) + [latent_dim]
    param_layers = []
    for i in range(len(param_dims) - 1):
        param_layers.append(init_linear(keys[kidx], param_dims[i], param_dims[i + 1]))
        kidx += 1

    # shape network: shape_i -> shape_h[0] -> ... -> shape_o
    shape_dims = [shape_i] + list(shape_h) + [shape_o]
    shape_layers = []
    for i in range(len(shape_dims) - 1):
        shape_layers.append(init_linear(keys[kidx], shape_dims[i], shape_dims[i + 1]))
        kidx += 1

    return param_layers, shape_layers


# ------------------------------ pure-JAX reference ---------------------------
def nif_pointwise_ref(inputs, param_layers, shape_layers, cfg_shape_net):
    shape_i = cfg_shape_net["input_dim"]
    shape_o = cfg_shape_net["output_dim"]
    total_units = list(cfg_shape_net["hidden_units"]) + [shape_o]

    s = inputs[:, :shape_i]
    p = inputs[:, shape_i:]
    for w, b in param_layers:                 # w (out, in), b (out, 1)
        p = jnp.tanh(p @ w.T + b[:, 0])
    latent = p
    off = 0
    for (w, b), d in zip(shape_layers, total_units):
        out = s @ w.T + b[:, 0]
        out = out * latent[:, off:off + d]
        s = jnp.tanh(out)
        off += d
    return s


# ---------------------------------- main -------------------------------------
if __name__ == "__main__":
    key = jax.random.PRNGKey(0)
    k_params, k_x = jax.random.split(key)

    param_layers, shape_layers = build_params(k_params, CFG_SHAPE_NET, CFG_PARAM_NET)

    B = 512   # small test size; wrapper picks tb=256 -> 2 grid steps (both v7x TCs)
    F = CFG_SHAPE_NET["input_dim"] + CFG_PARAM_NET["input_dim"]
    x = jax.random.normal(k_x, (B, F), jnp.float32)

    cd = _default_compute_dtype()
    out = nif_pointwise_forward(x, param_layers, shape_layers, CFG_SHAPE_NET,
                                target_tb=1024, compute_dtype=cd)
    out = jax.block_until_ready(out)

    ref = nif_pointwise_ref(x, param_layers, shape_layers, CFG_SHAPE_NET)
    assert out.shape == (B, CFG_SHAPE_NET["output_dim"])
    # bf16 tanh chain on v6e/v7x needs a relaxed tolerance; f32 path is exact-ish.
    tol = 1e-5 if cd == jnp.float32 else 5e-2
    assert jnp.allclose(out, ref, atol=tol, rtol=tol), "mismatch vs reference"

    print("KERNEL_OK")
</pallas_src>

<mosaic_0001>
module attributes {stable_mosaic.version = 11 : i64} {
  func.func @nif_pointwise_kernel(%arg0: i32, %arg1: memref<256x5xf32, #tpu.memory_space<vmem>>, %arg2: memref<32x4xf32, #tpu.memory_space<vmem>>, %arg3: memref<32x33xf32, #tpu.memory_space<vmem>>, %arg4: memref<65x33xf32, #tpu.memory_space<vmem>>, %arg5: memref<32x3xf32, #tpu.memory_space<vmem>>, %arg6: memref<32x33xf32, #tpu.memory_space<vmem>>, %arg7: memref<1x33xf32, #tpu.memory_space<vmem>>, %arg8: memref<1x256xf32, #tpu.memory_space<vmem>>) attributes {dimension_semantics = [#tpu.dimension_semantics<parallel>], iteration_bounds = array<i64: 2>, scalar_prefetch = 0 : i64, scratch_operands = 0 : i64, tpu.core_type = #tpu.core_type<tc>, window_params = [{transform_indices = @transform_0, window_bounds = array<i64: 256, 5>}, {pipeline_mode = #tpu.pipeline_mode<synchronous>, transform_indices = @transform_1, window_bounds = array<i64: 32, 4>}, {pipeline_mode = #tpu.pipeline_mode<synchronous>, transform_indices = @transform_2, window_bounds = array<i64: 32, 33>}, {pipeline_mode = #tpu.pipeline_mode<synchronous>, transform_indices = @transform_3, window_bounds = array<i64: 65, 33>}, {pipeline_mode = #tpu.pipeline_mode<synchronous>, transform_indices = @transform_4, window_bounds = array<i64: 32, 3>}, {pipeline_mode = #tpu.pipeline_mode<synchronous>, transform_indices = @transform_5, window_bounds = array<i64: 32, 33>}, {pipeline_mode = #tpu.pipeline_mode<synchronous>, transform_indices = @transform_6, window_bounds = array<i64: 1, 33>}, {transform_indices = @transform_7, window_bounds = array<i64: 1, 256>}]} {
    %c0 = arith.constant 0 : index
    %c0_0 = arith.constant 0 : index
    %0 = vector.load %arg1[%c0, %c0_0] : memref<256x5xf32, #tpu.memory_space<vmem>>, vector<256x5xf32>
    %c0_1 = arith.constant 0 : index
    %c0_2 = arith.constant 0 : index
    %1 = vector.load %arg2[%c0_1, %c0_2] : memref<32x4xf32, #tpu.memory_space<vmem>>, vector<32x4xf32>
    %2 = vector.extract_strided_slice %1 {offsets = [0, 0], sizes = [32, 3], strides = [1, 1]} : vector<32x4xf32> to vector<32x3xf32>
    %3 = vector.extract_strided_slice %1 {offsets = [0, 3], sizes = [32, 1], strides = [1, 1]} : vector<32x4xf32> to vector<32x1xf32>
    %4 = vector.extract_strided_slice %0 {offsets = [0, 2], sizes = [256, 3], strides = [1, 1]} : vector<256x5xf32> to vector<256x3xf32>
    %cst = arith.constant dense<0.000000e+00> : vector<32x256xf32>
    %5 = tpu.matmul %2, %4, %cst {dimension_numbers = #tpu.dot_dimension_numbers<[1], [1], [0], [0], [0, 0, 1, 0], [], []>} : vector<32x3xf32>, vector<256x3xf32>, vector<32x256xf32> -> vector<32x256xf32>
    %6 = vector.broadcast %3 : vector<32x1xf32> to vector<32x256xf32>
    %7 = arith.addf %5, %6 : vector<32x256xf32>
    %8 = math.tanh %7 : vector<32x256xf32>
    %c0_3 = arith.constant 0 : index
    %c0_4 = arith.constant 0 : index
    %9 = vector.load %arg3[%c0_3, %c0_4] : memref<32x33xf32, #tpu.memory_space<vmem>>, vector<32x33xf32>
    %10 = vector.extract_strided_slice %9 {offsets = [0, 0], sizes = [32, 32], strides = [1, 1]} : vector<32x33xf32> to vector<32x32xf32>
    %11 = vector.extract_strided_slice %9 {offsets = [0, 32], sizes = [32, 1], strides = [1, 1]} : vector<32x33xf32> to vector<32x1xf32>
    %cst_5 = arith.constant dense<0.000000e+00> : vector<32x256xf32>
    %12 = tpu.matmul %10, %8, %cst_5 {dimension_numbers = #tpu.dot_dimension_numbers<[1], [0], [0], [1], [0, 0, 1, 1], [], []>} : vector<32x32xf32>, vector<32x256xf32>, vector<32x256xf32> -> vector<32x256xf32>
    %13 = vector.broadcast %11 : vector<32x1xf32> to vector<32x256xf32>
    %14 = arith.addf %12, %13 : vector<32x256xf32>
    %15 = math.tanh %14 : vector<32x256xf32>
    %c0_6 = arith.constant 0 : index
    %c0_7 = arith.constant 0 : index
    %16 = vector.load %arg4[%c0_6, %c0_7] : memref<65x33xf32, #tpu.memory_space<vmem>>, vector<65x33xf32>
    %17 = vector.extract_strided_slice %16 {offsets = [0, 0], sizes = [65, 32], strides = [1, 1]} : vector<65x33xf32> to vector<65x32xf32>
    %18 = vector.extract_strided_slice %16 {offsets = [0, 32], sizes = [65, 1], strides = [1, 1]} : vector<65x33xf32> to vector<65x1xf32>
    %cst_8 = arith.constant dense<0.000000e+00> : vector<65x256xf32>
    %19 = tpu.matmul %17, %15, %cst_8 {dimension_numbers = #tpu.dot_dimension_numbers<[1], [0], [0], [1], [0, 0, 1, 1], [], []>} : vector<65x32xf32>, vector<32x256xf32>, vector<65x256xf32> -> vector<65x256xf32>
    %20 = vector.broadcast %18 : vector<65x1xf32> to vector<65x256xf32>
    %21 = arith.addf %19, %20 : vector<65x256xf32>
    %22 = math.tanh %21 : vector<65x256xf32>
    %c0_9 = arith.constant 0 : index
    %c0_10 = arith.constant 0 : index
    %23 = vector.load %arg5[%c0_9, %c0_10] : memref<32x3xf32, #tpu.memory_space<vmem>>, vector<32x3xf32>
    %24 = vector.extract_strided_slice %23 {offsets = [0, 0], sizes = [32, 2], strides = [1, 1]} : vector<32x3xf32> to vector<32x2xf32>
    %25 = vector.extract_strided_slice %23 {offsets = [0, 2], sizes = [32, 1], strides = [1, 1]} : vector<32x3xf32> to vector<32x1xf32>
    %26 = vector.extract_strided_slice %0 {offsets = [0, 0], sizes = [256, 2], strides = [1, 1]} : vector<256x5xf32> to vector<256x2xf32>
    %cst_11 = arith.constant dense<0.000000e+00> : vector<32x256xf32>
    %27 = tpu.matmul %24, %26, %cst_11 {dimension_numbers = #tpu.dot_dimension_numbers<[1], [1], [0], [0], [0, 0, 1, 0], [], []>} : vector<32x2xf32>, vector<256x2xf32>, vector<32x256xf32> -> vector<32x256xf32>
    %28 = vector.broadcast %25 : vector<32x1xf32> to vector<32x256xf32>
    %29 = arith.addf %27, %28 : vector<32x256xf32>
    %30 = vector.extract_strided_slice %22 {offsets = [0, 0], sizes = [32, 256], strides = [1, 1]} : vector<65x256xf32> to vector<32x256xf32>
    %31 = arith.mulf %29, %30 : vector<32x256xf32>
    %32 = math.tanh %31 : vector<32x256xf32>
    %c0_12 = arith.constant 0 : index
    %c0_13 = arith.constant 0 : index
    %33 = vector.load %arg6[%c0_12, %c0_13] : memref<32x33xf32, #tpu.memory_space<vmem>>, vector<32x33xf32>
    %34 = vector.extract_strided_slice %33 {offsets = [0, 0], sizes = [32, 32], strides = [1, 1]} : vector<32x33xf32> to vector<32x32xf32>
    %35 = vector.extract_strided_slice %33 {offsets = [0, 32], sizes = [32, 1], strides = [1, 1]} : vector<32x33xf32> to vector<32x1xf32>
    %cst_14 = arith.constant dense<0.000000e+00> : vector<32x256xf32>
    %36 = tpu.matmul %34, %32, %cst_14 {dimension_numbers = #tpu.dot_dimension_numbers<[1], [0], [0], [1], [0, 0, 1, 1], [], []>} : vector<32x32xf32>, vector<32x256xf32>, vector<32x256xf32> -> vector<32x256xf32>
    %37 = vector.broadcast %35 : vector<32x1xf32> to vector<32x256xf32>
    %38 = arith.addf %36, %37 : vector<32x256xf32>
    %39 = vector.extract_strided_slice %22 {offsets = [32, 0], sizes = [32, 256], strides = [1, 1]} : vector<65x256xf32> to vector<32x256xf32>
    %40 = arith.mulf %38, %39 : vector<32x256xf32>
    %41 = math.tanh %40 : vector<32x256xf32>
    %c0_15 = arith.constant 0 : index
    %c0_16 = arith.constant 0 : index
    %42 = vector.load %arg7[%c0_15, %c0_16] : memref<1x33xf32, #tpu.memory_space<vmem>>, vector<1x33xf32>
    %43 = vector.extract_strided_slice %42 {offsets = [0, 0], sizes = [1, 32], strides = [1, 1]} : vector<1x33xf32> to vector<1x32xf32>
    %44 = vector.extract_strided_slice %42 {offsets = [0, 32], sizes = [1, 1], strides = [1, 1]} : vector<1x33xf32> to vector<1x1xf32>
    %cst_17 = arith.constant dense<0.000000e+00> : vector<1x256xf32>
    %45 = tpu.matmul %43, %41, %cst_17 {dimension_numbers = #tpu.dot_dimension_numbers<[1], [0], [0], [1], [0, 0, 1, 1], [], []>} : vector<1x32xf32>, vector<32x256xf32>, vector<1x256xf32> -> vector<1x256xf32>
    %46 = vector.broadcast %44 : vector<1x1xf32> to vector<1x256xf32>
    %47 = arith.addf %45, %46 : vector<1x256xf32>
    %48 = vector.extract_strided_slice %22 {offsets = [64, 0], sizes = [1, 256], strides = [1, 1]} : vector<65x256xf32> to vector<1x256xf32>
    %49 = arith.mulf %47, %48 : vector<1x256xf32>
    %50 = math.tanh %49 : vector<1x256xf32>
    %c0_18 = arith.constant 0 : index
    %c0_19 = arith.constant 0 : index
    %51 = vector.load %arg8[%c0_18, %c0_19] : memref<1x256xf32, #tpu.memory_space<vmem>>, vector<1x256xf32>
    tpu.vector_store %arg8[%c0_18, %c0_19], %50 {strides = array<i32>} : memref<1x256xf32, #tpu.memory_space<vmem>>, vector<1x256xf32>,
    return
  }
  func.func @transform_0(%arg0: i32) -> (i32, i32) {
    %c0_i32 = arith.constant 0 : i32
    %c0_i32_0 = arith.constant 0 : i32
    return %arg0, %c0_i32 : i32, i32
  }
  func.func @transform_1(%arg0: i32) -> (i32, i32) {
    %c0_i32 = arith.constant 0 : i32
    %c0_i32_0 = arith.constant 0 : i32
    %c0_i32_1 = arith.constant 0 : i32
    return %c0_i32, %c0_i32_0 : i32, i32
  }
  func.func @transform_2(%arg0: i32) -> (i32, i32) {
    %c0_i32 = arith.constant 0 : i32
    %c0_i32_0 = arith.constant 0 : i32
    %c0_i32_1 = arith.constant 0 : i32
    return %c0_i32, %c0_i32_0 : i32, i32
  }
  func.func @transform_3(%arg0: i32) -> (i32, i32) {
    %c0_i32 = arith.constant 0 : i32
    %c0_i32_0 = arith.constant 0 : i32
    %c0_i32_1 = arith.constant 0 : i32
    return %c0_i32, %c0_i32_0 : i32, i32
  }
  func.func @transform_4(%arg0: i32) -> (i32, i32) {
    %c0_i32 = arith.constant 0 : i32
    %c0_i32_0 = arith.constant 0 : i32
    %c0_i32_1 = arith.constant 0 : i32
    return %c0_i32, %c0_i32_0 : i32, i32
  }
  func.func @transform_5(%arg0: i32) -> (i32, i32) {
    %c0_i32 = arith.constant 0 : i32
    %c0_i32_0 = arith.constant 0 : i32
    %c0_i32_1 = arith.constant 0 : i32
    return %c0_i32, %c0_i32_0 : i32, i32
  }
  func.func @transform_6(%arg0: i32) -> (i32, i32) {
    %c0_i32 = arith.constant 0 : i32
    %c0_i32_0 = arith.constant 0 : i32
    %c0_i32_1 = arith.constant 0 : i32
    return %c0_i32, %c0_i32_0 : i32, i32
  }
  func.func @transform_7(%arg0: i32) -> (i32, i32) {
    %c0_i32 = arith.constant 0 : i32
    %c0_i32_0 = arith.constant 0 : i32
    return %c0_i32, %arg0 : i32, i32
  }
}

</mosaic_0001>

<bundles_post_ra>
// kernel: tpu_custom_call.1
= control target key start
LH: loop header
LB: loop body
LE: loop exit
PB: predicated region body
PF: predicated region fallthrough
CT: control target
= control target key end

     0   :  { %12 = vsyncpa [#allocation3], 0  ;;  %s2525_s0 = inlined_call_operand.vmem [shape: f32[512,5], index: 0, kind: input, shape index: {}]   ;;  %s2526_s1 = inlined_call_operand.vmem [shape: f32[32,4], index: 1, kind: input, shape index: {}]   ;;  %s2527_s2 = inlined_call_operand.vmem [shape: f32[32,33], index: 2, kind: input, shape index: {}]   ;;  %s2528_s3 = inlined_call_operand.vmem [shape: f32[65,33], index: 3, kind: input, shape index: {}]   ;;  %s2529_s4 = inlined_call_operand.vmem [shape: f32[32,3], index: 4, kind: input, shape index: {}]   ;;  %s2530_s5 = inlined_call_operand.vmem [shape: f32[32,33], index: 5, kind: input, shape index: {}]   ;;  %s2531_s6 = inlined_call_operand.vmem [shape: f32[1,33], index: 6, kind: input, shape index: {}]   ;;  %s2532_s7 = inlined_call_operand.hbm [shape: f32[1,512], index: 7, kind: output, shape index: {}]  }
   0x1   :  { %14 = vsyncpa [#allocation3 + $0x1], 0  ;;  %s1913_s24 = smov 0   ;;  %s1915_s25 = smov 0  }
   0x2   :  { %s1917_s26 = smov 0   ;;  %s1919_s27 = smov 0  }
   0x3 LB: > { %s1463_s28 = sadd.s32 4294967295, %s1864_s27   ;;  %s1464_s29 = sadd.s32 4294967294, %s1864_s27   ;;  %s1864_s27 = sphi %s1919_s27, %s2559_s27   ;;  %s1860_s26 = sphi %s1917_s26, %s2558_s26   ;;  %s1856_s25 = sphi %s1915_s25, %s2557_s25   ;;  %s1852_s24 = sphi %s1913_s24, %s2556_s24  }
   0x4   : > { %s1936_s30 = sadd.s32 1, %s1864_s27   ;;  %s179_s8 = sadd.s32 1, %s1860_s26 }
   0x5   : > { %s176_s9 = ssub.s32 %s1864_s27, %s1936_s30  ;;  %p189_p0 = scmp.ne.s32.totalorder %s1860_s26, %s1856_s25 }
   0x6   : > { %p177_p1 = scmp.eq.s32.totalorder %s176_s9, 0  ;;  %p190_p2 = scmp.eq.s32.totalorder %s1463_s28, 1 }
   0x7   : > { %p195_p3 = scmp.ne.s32.totalorder %s1856_s25, %s1852_s24  ;;  %p196_p4 = scmp.eq.s32.totalorder %s1464_s29, 1 }
   0x8   : > { %s1946_s10 = scalar_select %p177_p1, %s1860_s26, %s179_s8  }
   0x9   : > { %p1948_p5 = por %p190_p2, %p189_p0  ;;  %p1952_p6 = por %p196_p4, %p195_p3 }
   0xa   : > { %p1467_p7 = scmp.ge.s32.totalorder %s1864_s27, 1  ;;  %p241_p8 = scmp.lt.s32.totalorder %s1864_s27, 3 }
   0xc   : > { %p242_p9 = pnand %p1467_p7, %p241_p8 }
   0xe   : > { %245 = sbr.rel (%p242_p9) target bundleno = 1433 (0x599), region = 48 }
  0x13   : > { %s1958_s13 = sshll.u32 %s1463_s28, 5  ;;  %s1866_s19 = smov 126   ;;  %v2106_v28 = vld [vmem:[%s2526_s1] sm:$0xff]  ;;  %vm432_vm0 = vcmask 23552   ;;  %v2137_v33 = vld [vmem:[%s2526_s1 + $0x10] sm:$0xff]  ;;  %v2142_v34 = vld [vmem:[%s2526_s1 + $0x18] sm:$0xff] }
  0x14   : > { %p274_p10 = scmp.lt.s32.totalorder %s1958_s13, 63  ;;  %1599 = vmatprep.mubr.msk.f32.mxu0 %vm432_vm0, %v2106_v28  ;;  %v1867_v35 = vmov 3   ;;  %v2149_v36 = vld [vmem:[%s2526_s1 + $0x8] sm:$0xff]  ;;  %vm626_vm1 = vcmask 261120   ;;  %vm965_vm2 = vcmask 15360   ;;  %s270_s16 = sand.u32 1, %s1856_s25  }
  0x15   : > { %1692 = vset.pattern.permute.xlu0 %v1867_v35  ;;  %1693 = vset.pattern.permute.xlu1 %v1867_v35  ;;  %s1468_s17 = sshll.u32 %s270_s16, 1  ;;  %s1403_s22 = scalar_lea.hbm %s2532_s7, %s1958_s13 }
  0x16   : > { %s275_s14 = scalar_select %p274_p10, %s1958_s13, 63 }
  0x17   : > { %s1391_s23 = scalar_lea.sflag [#allocation3], %s270_s16  ;;  %s1872_s29 = smov [#allocation2]  }
  0x18   : > { %s1470_s15 = sshll.u32 %s275_s14, 3  ;;  %s1808_s8 = sshll.u32 %s1872_s29, 4  ;;  %s1809_s8 = int_to_ptr.vmem [resolvable:$false] %s1808_s8 }
  0x19   : > { %s1965_s18 = scalar_lea.vmem %s2525_s0, %s1470_s15  ;;  %s1810_s9 = scalar_lea.vmem %s1809_s8, 64 }
  0x1a   : > { %v1968_v0 = vld [vmem:[%s1965_s18 + $0xf8] sm:$0xff]  ;;  %v1971_v1 = vld [vmem:[%s1965_s18 + $0xf0] sm:$0xff]  ;;  %v1988_v4 = vld [vmem:[%s1965_s18 + $0xe8] sm:$0xff] }
  0x1b   : > { %430 = vrot.lane.b32.xlu0 %v1968_v0, %s1866_s19  ;;  %428 = vrot.lane.b32.xlu1 %v1971_v1, %s1866_s19  ;;  %v1978_v2 = vld [vmem:[%s1965_s18 + $0x78] sm:$0xff]  ;;  %v1981_v3 = vld [vmem:[%s1965_s18 + $0x70] sm:$0xff] }
  0x1c   : > { %v1991_v5 = vld [vmem:[%s1965_s18 + $0x68] sm:$0xff]  ;;  %v1998_v6 = vld [vmem:[%s1965_s18 + $0xe0] sm:$0xff]  ;;  %v2008_v8 = vld [vmem:[%s1965_s18 + $0xd8] sm:$0xff] }
  0x1d   : > { %v2001_v7 = vld [vmem:[%s1965_s18 + $0x60] sm:$0xff]  ;;  %v2011_v9 = vld [vmem:[%s1965_s18 + $0x58] sm:$0xff]  ;;  %v2018_v10 = vld [vmem:[%s1965_s18 + $0xd0] sm:$0xff] }
  0x1e   : > { %v2021_v11 = vld [vmem:[%s1965_s18 + $0x50] sm:$0xff]  ;;  %v2028_v12 = vld [vmem:[%s1965_s18 + $0xc8] sm:$0xff]  ;;  %v2038_v14 = vld [vmem:[%s1965_s18 + $0xc0] sm:$0xff] }
  0x1f   : > { %398 = vrot.lane.b32.xlu0 %v1978_v2, %s1866_s19  ;;  %396 = vrot.lane.b32.xlu1 %v1981_v3, %s1866_s19  ;;  %v2031_v13 = vld [vmem:[%s1965_s18 + $0x48] sm:$0xff]  ;;  %v2041_v15 = vld [vmem:[%s1965_s18 + $0x40] sm:$0xff] }
  0x20   : > { %v2048_v16 = vld [vmem:[%s1965_s18 + $0xb8] sm:$0xff]  ;;  %v2058_v18 = vld [vmem:[%s1965_s18 + $0xb0] sm:$0xff]  ;;  %v2068_v20 = vld [vmem:[%s1965_s18 + $0xa8] sm:$0xff] }
  0x21   : > { %v2051_v17 = vld [vmem:[%s1965_s18 + $0x38] sm:$0xff]  ;;  %v2061_v19 = vld [vmem:[%s1965_s18 + $0x30] sm:$0xff]  ;;  %v2071_v21 = vld [vmem:[%s1965_s18 + $0x28] sm:$0xff] }
  0x22   : > { %v2078_v22 = vld [vmem:[%s1965_s18 + $0xa0] sm:$0xff]  ;;  %v2088_v24 = vld [vmem:[%s1965_s18 + $0x98] sm:$0xff]  ;;  %v2098_v26 = vld [vmem:[%s1965_s18 + $0x90] sm:$0xff] }
  0x23   : > { %426 = vrot.lane.b32.xlu0 %v1988_v4, %s1866_s19  ;;  %394 = vrot.lane.b32.xlu1 %v1991_v5, %s1866_s19  ;;  %v2081_v23 = vld [vmem:[%s1965_s18 + $0x20] sm:$0xff]  ;;  %v2091_v25 = vld [vmem:[%s1965_s18 + $0x18] sm:$0xff] }
  0x24   : > { %v2101_v27 = vld [vmem:[%s1965_s18 + $0x10] sm:$0xff]  ;;  %v2113_v29 = vld [vmem:[%s1965_s18 + $0x88] sm:$0xff]  ;;  %v2125_v31 = vld [vmem:[%s1965_s18 + $0x80] sm:$0xff] }
  0x25   : > { %v2116_v30 = vld [vmem:[%s1965_s18 + $0x8] sm:$0xff]  ;;  %v2128_v32 = vld [vmem:[%s1965_s18] sm:$0xff]  ;;  %s272_s18 = scalar_lea.vmem [#allocation2], %s1468_s17 }
  0x27   : > { %424 = vrot.lane.b32.xlu0 %v1998_v6, %s1866_s19  ;;  %392 = vrot.lane.b32.xlu1 %v2001_v7, %s1866_s19 }
  0x2b   : > { %422 = vrot.lane.b32.xlu0 %v2008_v8, %s1866_s19  ;;  %390 = vrot.lane.b32.xlu1 %v2011_v9, %s1866_s19 }
  0x2f   : > { %420 = vrot.lane.b32.xlu0 %v2018_v10, %s1866_s19  ;;  %388 = vrot.lane.b32.xlu1 %v2021_v11, %s1866_s19 }
  0x33   : > { %418 = vrot.lane.b32.xlu0 %v2028_v12, %s1866_s19  ;;  %386 = vrot.lane.b32.xlu1 %v2031_v13, %s1866_s19 }
  0x37   : > { %416 = vrot.lane.b32.xlu0 %v2038_v14, %s1866_s19  ;;  %384 = vrot.lane.b32.xlu1 %v2041_v15, %s1866_s19 }
  0x3b   : > { %414 = vrot.lane.b32.xlu0 %v2048_v16, %s1866_s19  ;;  %382 = vrot.lane.b32.xlu1 %v2051_v17, %s1866_s19 }
  0x3f   : > { %412 = vrot.lane.b32.xlu0 %v2058_v18, %s1866_s19  ;;  %380 = vrot.lane.b32.xlu1 %v2061_v19, %s1866_s19 }
  0x43   : > { %410 = vrot.lane.b32.xlu0 %v2068_v20, %s1866_s19  ;;  %378 = vrot.lane.b32.xlu1 %v2071_v21, %s1866_s19 }
  0x47   : > { %408 = vrot.lane.b32.xlu0 %v2078_v22, %s1866_s19  ;;  %376 = vrot.lane.b32.xlu1 %v2081_v23, %s1866_s19 }
  0x4b   : > { %406 = vrot.lane.b32.xlu0 %v2088_v24, %s1866_s19  ;;  %374 = vrot.lane.b32.xlu1 %v2091_v25, %s1866_s19 }
  0x4f   : > { %404 = vrot.lane.b32.xlu0 %v2098_v26, %s1866_s19  ;;  %372 = vrot.lane.b32.xlu1 %v2101_v27, %s1866_s19 }
  0x53   : > { %402 = vrot.lane.b32.xlu0 %v2113_v29, %s1866_s19  ;;  %370 = vrot.lane.b32.xlu1 %v2116_v30, %s1866_s19 }
  0x57   : > { %400 = vrot.lane.b32.xlu0 %v2125_v31, %s1866_s19  ;;  %368 = vrot.lane.b32.xlu1 %v2128_v32, %s1866_s19  ;;  %s1405_s19 = sshll.u32 %s272_s18, 4  ;;  %s1406_s19 = int_to_ptr.vmem [resolvable:$true] %s1405_s19 }
  0x58   : > { %s1804_s28 = scalar_lea.vmem %s1406_s19, 32  ;;  %p1811_p0 = scmp.lt.s32.totalorder %s1406_s19, %s1809_s8 }
  0x59   : > { %p1805_p11 = scmp.ne.s32.totalorder %s1406_s19, %s1804_s28  ;;  %p1812_p1 = scmp.lt.s32.totalorder %s1810_s9, %s1804_s28 }
  0x5b   : > { %333 = vperm.xlu0 %1692, %v2142_v34   ;;  %328 = vperm.xlu1 %1693, %v2137_v33   ;;  %p1806_p12 = pnand %p1805_p11, %p1948_p5  ;;  %p1813_p2 = por %p1812_p1, %p1811_p0 }
  0x5d   : > { %p1807_p13 = pneg %p1806_p12 }
  0x5f   : > { %318 = vperm.xlu0 %1692, %v2106_v28   ;;  %323 = vperm.xlu1 %1693, %v2149_v36   ;;  %p1814_p3 = pnand %p1813_p2, %p1807_p13 }
  0x8d   : > { %v431_v37 = vpop.permute.xlu0 %430  ;;  %v429_v38 = vpop.permute.xlu1 %428 }
  0x8e   : > { %1567 = vmatprep.subr.msk.mxu0 %vm432_vm0, %v431_v37 }
  0x91   : > { %v399_v39 = vpop.permute.xlu0 %398  ;;  %v397_v40 = vpop.permute.xlu1 %396 }
  0x92   : > { %1568 = vmatpush3.xpose.msk.msra.mxu0 %vm432_vm0, %v399_v39 }
  0x93   : > { %1569 = vmatprep.subr.msk.mxu0 %vm432_vm0, %v429_v38 }
  0x95   : > { %v427_v41 = vpop.permute.xlu0 %426  ;;  %v395_v42 = vpop.permute.xlu1 %394 }
  0x96   : > { %1570 = vmatpush3.xpose.msk.msra.mxu0 %vm432_vm0, %v397_v40 }
  0x97   : > { %1571 = vmatprep.subr.msk.mxu0 %vm432_vm0, %v427_v41  ;;  %v2533_v41 = vmov 0.0  }
  0x98   : > { %699 = vmatprep.mubr.f32.mxu1 %v2533_v41 }
  0x99   : > { %v425_v43 = vpop.permute.xlu0 %424  ;;  %v393_v44 = vpop.permute.xlu1 %392 }
  0x9a   : > { %1572 = vmatpush3.xpose.msk.msra.mxu0 %vm432_vm0, %v395_v42  ;;  %v603_v42 = vld [vmem:[%s2527_s2 + $0x8] sm:$0xff] }
  0x9b   : > { %1573 = vmatprep.subr.msk.mxu0 %vm432_vm0, %v425_v43  ;;  %v2227_v43 = vld [vmem:[%s2528_s3 + $0x8] sm:$0xff] }
  0x9d   : > { %v423_v45 = vpop.permute.xlu0 %422  ;;  %v391_v46 = vpop.permute.xlu1 %390 }
  0x9e   : > { %1574 = vmatpush3.xpose.msk.msra.mxu0 %vm432_vm0, %v393_v44  ;;  %v602_v44 = vld [vmem:[%s2527_s2] sm:$0xff] }
  0x9f   : > { %1575 = vmatprep.subr.msk.mxu0 %vm432_vm0, %v423_v45  ;;  %v2236_v45 = vld [vmem:[%s2528_s3 + $0x10] sm:$0xff] }
  0xa1   : > { %v421_v47 = vpop.permute.xlu0 %420  ;;  %v389_v48 = vpop.permute.xlu1 %388 }
  0xa2   : > { %1576 = vmatpush3.xpose.msk.msra.mxu0 %vm432_vm0, %v391_v46  ;;  %v2242_v46 = vld [vmem:[%s2528_s3] sm:$0xff] }
  0xa3   : > { %1577 = vmatprep.subr.msk.mxu0 %vm432_vm0, %v421_v47 }
  0xa5   : > { %v419_v49 = vpop.permute.xlu0 %418  ;;  %v387_v50 = vpop.permute.xlu1 %386 }
  0xa6   : > { %1578 = vmatpush3.xpose.msk.msra.mxu0 %vm432_vm0, %v389_v48 }
  0xa7   : > { %1579 = vmatprep.subr.msk.mxu0 %vm432_vm0, %v419_v49 }
  0xa9   : > { %v417_v51 = vpop.permute.xlu0 %416  ;;  %v385_v52 = vpop.permute.xlu1 %384 }
  0xaa   : > { %1580 = vmatpush3.xpose.msk.msra.mxu0 %vm432_vm0, %v387_v50 }
  0xab   : > { %1581 = vmatprep.subr.msk.mxu0 %vm432_vm0, %v417_v51 }
  0xad   : > { %v415_v53 = vpop.permute.xlu0 %414  ;;  %v383_v54 = vpop.permute.xlu1 %382 }
  0xae   : > { %1582 = vmatpush3.xpose.msk.msra.mxu0 %vm432_vm0, %v385_v52 }
  0xaf   : > { %1583 = vmatprep.subr.msk.mxu0 %vm432_vm0, %v415_v53 }
  0xb1   : > { %v413_v55 = vpop.permute.xlu0 %412  ;;  %v381_v56 = vpop.permute.xlu1 %380 }
  0xb2   : > { %1584 = vmatpush3.xpose.msk.msra.mxu0 %vm432_vm0, %v383_v54 }
  0xb3   : > { %1585 = vmatprep.subr.msk.mxu0 %vm432_vm0, %v413_v55 }
  0xb5   : > { %v411_v57 = vpop.permute.xlu0 %410  ;;  %v379_v58 = vpop.permute.xlu1 %378 }
  0xb6   : > { %1586 = vmatpush3.xpose.msk.msra.mxu0 %vm432_vm0, %v381_v56 }
  0xb7   : > { %1587 = vmatprep.subr.msk.mxu0 %vm432_vm0, %v411_v57 }
  0xb9   : > { %v409_v59 = vpop.permute.xlu0 %408  ;;  %v377_v60 = vpop.permute.xlu1 %376 }
  0xba   : > { %1588 = vmatpush3.xpose.msk.msra.mxu0 %vm432_vm0, %v379_v58 }
  0xbb   : > { %1589 = vmatprep.subr.msk.mxu0 %vm432_vm0, %v409_v59 }
  0xbd   : > { %v407_v61 = vpop.permute.xlu0 %406  ;;  %v375_v62 = vpop.permute.xlu1 %374 }
  0xbe   : > { %1590 = vmatpush3.xpose.msk.msra.mxu0 %vm432_vm0, %v377_v60 }
  0xbf   : > { %1591 = vmatprep.subr.msk.mxu0 %vm432_vm0, %v407_v61 }
  0xc1   : > { %v405_v63 = vpop.permute.xlu0 %404  ;;  %v373_v35 = vpop.permute.xlu1 %372 }
  0xc2   : > { %1592 = vmatpush3.xpose.msk.msra.mxu0 %vm432_vm0, %v375_v62 }
  0xc3   : > { %1593 = vmatprep.subr.msk.mxu0 %vm432_vm0, %v405_v63 }
  0xc5   : > { %v403_v37 = vpop.permute.xlu0 %402  ;;  %v371_v38 = vpop.permute.xlu1 %370 }
  0xc6   : > { %1594 = vmatpush3.xpose.msk.msra.mxu0 %vm432_vm0, %v373_v35 }
  0xc7   : > { %1595 = vmatprep.subr.msk.mxu0 %vm432_vm0, %v403_v37 }
  0xc9   : > { %v401_v39 = vpop.permute.xlu0 %400  ;;  %v369_v40 = vpop.permute.xlu1 %368 }
  0xca   : > { %1596 = vmatpush3.xpose.msk.msra.mxu0 %vm432_vm0, %v371_v38 }
  0xcb   : > { %1597 = vmatprep.subr.msk.mxu0 %vm432_vm0, %v401_v39 }
  0xce   : > { %1598 = vmatpush3.xpose.msk.msra.mxu0 %vm432_vm0, %v369_v40 }
  0xd1   : > { %1600 = vmatmul.mubr.msk.f32.vlgmr.msra.gmra.mxu0 %vm432_vm0, %v2106_v28  ;;  %v2204_v28 = vld [vmem:[%s2527_s2 + $0x10] sm:$0xff] }
  0xd2   : > { %1601 = vmatprep.mubr.msk.f32.mxu0 %vm432_vm0, %v2149_v36 }
  0xd5   : > { %1602 = vmatmul.mubr.msk.f32.gmra.mxu0 %vm432_vm0, %v2149_v36  ;;  %v1869_v36 = vmov 32  }
  0xd6   : > { %1603 = vmatprep.mubr.msk.f32.mxu0 %vm432_vm0, %v2137_v33  ;;  %1694 = vset.pattern.permute.xlu1 %v1869_v36  ;;  %v329_v52 = vpop.permute.xlu1 %328  ;;  %v334_v54 = vpop.permute.xlu0 %333 }
  0xd7   : > { %1695 = vset.pattern.permute.xlu0 %v1869_v36 }
  0xd8   : > { %618 = vperm.xlu0 %1695, %v2204_v28  }
  0xd9   : > { %1604 = vmatmul.mubr.msk.f32.gmra.mxu0 %vm432_vm0, %v2137_v33  ;;  %v2209_v33 = vld [vmem:[%s2527_s2 + $0x18] sm:$0xff] }
  0xda   : > { %1605 = vmatprep.mubr.msk.f32.mxu0 %vm432_vm0, %v2142_v34  ;;  %623 = vperm.xlu1 %1694, %v2209_v33   ;;  %v324_v58 = vpop.permute.xlu1 %323  ;;  %v319_v62 = vpop.permute.xlu0 %318 }
  0xdd   : > { %1606 = vmatmul.mubr.msk.f32.gmra.mxu0 %vm432_vm0, %v2142_v34  ;;  %v2218_v34 = vld [vmem:[%s2528_s3 + $0x18] sm:$0xff] }
  0xde   : > { %1239 = vmatprep.mubr.f32.mxu0 %v2533_v41  ;;  %613 = vperm.xlu1 %1694, %v603_v42  }
  0xdf   : > { %758 = vperm.xlu0 %1695, %v2218_v34  }
  0xe2   : > { %608 = vperm.xlu1 %1694, %v602_v44  }
  0xe3   : > { %748 = vperm.xlu0 %1695, %v2227_v43  }
  0xe6   : > { %753 = vperm.xlu1 %1694, %v2236_v45  }
  0xea   : > { %743 = vperm.xlu1 %1694, %v2242_v46  }
 0x191   : > { %v571_v47 = vpop.f32.mrf.mxu0 }
 0x192   : > { %v572_v38 = vadd.f32 %v571_v47, %v319_v62 }
 0x193   : > { %v573_v48 = vpop.f32.mrf.mxu0 }
 0x194   : > { %v574_v37 = vadd.f32 %v573_v48, %v319_v62  ;;  %v1870_v48 = vmov 2   ;;  %v2313_v62 = vld [vmem:[%s2528_s3 + $0x20] sm:$0xff] }
 0x195   : > { %v577_v49 = vpop.f32.mrf.mxu0  ;;  %1697 = vset.pattern.permute.xlu1 %v1870_v48  ;;  %1696 = vset.pattern.permute.xlu0 %v1870_v48 }
 0x196   : > { %v578_v35 = vadd.f32 %v577_v49, %v324_v58 }
 0x197   : > { %v579_v50 = vpop.f32.mrf.mxu0 }
 0x198   : > { %v580_v63 = vadd.f32 %v579_v50, %v324_v58  ;;  %v2301_v58 = vld [vmem:[%s2528_s3 + $0x28] sm:$0xff] }
 0x199   : > { %v583_v51 = vpop.f32.mrf.mxu0 }
 0x19a   : > { %v584_v61 = vadd.f32 %v583_v51, %v329_v52 }
 0x19b   : > { %v585_v53 = vpop.f32.mrf.mxu0 }
 0x19c   : > { %v586_v59 = vadd.f32 %v585_v53, %v329_v52  ;;  %v2282_v52 = vld [vmem:[%s2528_s3 + $0x30] sm:$0xff] }
 0x19d   : > { %v589_v55 = vpop.f32.mrf.mxu0 }
 0x19e   : > { %v590_v56 = vadd.f32 %v589_v55, %v334_v54 }
 0x19f   : > { %v591_v57 = vpop.f32.mrf.mxu0 }
 0x1a0   : > { %v592_v60 = vadd.f32 %v591_v57, %v334_v54  ;;  %v2287_v54 = vld [vmem:[%s2528_s3 + $0x38] sm:$0xff] }
 0x1a2   : > { %1700 = vtanh.f32 %v592_v60 }
 0x1a3   : > { %1702 = vtanh.f32 %v590_v56  ;;  %v2296_v56 = vld [vmem:[%s2530_s5 + $0x18] sm:$0xff] }
 0x1a4   : > { %1704 = vtanh.f32 %v586_v59  ;;  %2548 = vst [vmem:[#allocation8_spill] sm:$0xff] %v2296_v56 }
 0x1a5   : > { %1706 = vtanh.f32 %v584_v61  ;;  %v624_v61 = vpop.permute.xlu1 %623 }
 0x1a6   : > { %1708 = vtanh.f32 %v580_v63 }
 0x1a7   : > { %1710 = vtanh.f32 %v578_v35 }
 0x1a8   : > { %1712 = vtanh.f32 %v574_v37  ;;  %v2320_v37 = vld [vmem:[%s2528_s3 + $0x40] sm:$0x1] }
 0x1a9   : > { %1714 = vtanh.f32 %v572_v38 }
 0x1af   : > { %v1701_v39 = vpop.eup %1700 }
 0x1b0   : > { %v1703_v40 = vpop.eup %1702  ;;  %659 = vmatprep.subr.mxu1 %v1701_v39  ;;  %v614_v39 = vpop.permute.xlu1 %613 }
 0x1b1   : > { %v1705_v55 = vpop.eup %1704  ;;  %660 = vmatpush1.msra.mxu1 %v1703_v40 }
 0x1b2   : > { %v1707_v53 = vpop.eup %1706  ;;  %661 = vmatprep.subr.mxu1 %v1705_v55  ;;  %v619_v55 = vpop.permute.xlu0 %618 }
 0x1b3   : > { %v1709_v51 = vpop.eup %1708  ;;  %662 = vmatpush1.msra.mxu1 %v1707_v53 }
 0x1b4   : > { %v1711_v50 = vpop.eup %1710  ;;  %663 = vmatprep.subr.mxu1 %v1709_v51  ;;  %v609_v48 = vpop.permute.xlu1 %608 }
 0x1b5   : > { %v1713_v49 = vpop.eup %1712  ;;  %664 = vmatpush1.msra.mxu1 %v1711_v50 }
 0x1b6   : > { %v1715_v47 = vpop.eup %1714  ;;  %665 = vmatprep.subr.mxu1 %v1713_v49 }
 0x1b7   : > { %666 = vmatpush1.msra.mxu1 %v1715_v47 }
 0x1b8   : > { %1507 = vmatmul.mubr.msk.f32.vlgmr.msra.gmra.mxu1 %vm626_vm1, %v602_v44  ;;  %v2258_v44 = vld [vmem:[%s2529_s4 + $0x10] sm:$0xff] }
 0x1b9   : > { %705 = vmatprep.mubr.f32.mxu1 %v2533_v41  ;;  %2545 = vst [vmem:[#allocation5_spill] sm:$0xff] %v2258_v44  ;;  %957 = vperm.xlu1 %1697, %v2258_v44  }
 0x1bc   : > { %1508 = vmatmul.mubr.msk.f32.gmra.mxu1 %vm626_vm1, %v603_v42  ;;  %v2263_v42 = vld [vmem:[%s2529_s4 + $0x18] sm:$0xff] }
 0x1bd   : > { %711 = vmatprep.mubr.f32.mxu1 %v2533_v41  ;;  %2546 = vst [vmem:[#allocation6_spill] sm:$0xff] %v2263_v42  ;;  %962 = vperm.xlu0 %1696, %v2263_v42  }
 0x1c0   : > { %1509 = vmatmul.mubr.msk.f32.gmra.mxu1 %vm626_vm1, %v2204_v28  ;;  %v2270_v28 = vld [vmem:[%s2529_s4] sm:$0xff] }
 0x1c1   : > { %717 = vmatprep.mubr.f32.mxu1 %v2533_v41  ;;  %947 = vperm.xlu0 %1696, %v2270_v28  }
 0x1c4   : > { %1510 = vmatmul.mubr.msk.f32.gmra.mxu1 %vm626_vm1, %v2209_v33  ;;  %v2275_v33 = vld [vmem:[%s2529_s4 + $0x8] sm:$0xff] }
 0x1c5   : > { %868 = vmatprep.mubr.f32.mxu1 %v2533_v41  ;;  %2547 = vst [vmem:[#allocation7_spill] sm:$0xff] %v2275_v33  ;;  %952 = vperm.xlu1 %1697, %v2275_v33  }
 0x1c6   : > { %1699 = vset.pattern.permute.xlu0 %v1869_v36 }
 0x1c7   : > { %773 = vperm.xlu0 %1699, %v2282_v52  }
 0x1c9   : > { %1698 = vset.pattern.permute.xlu1 %v1869_v36  ;;  %v2308_v36 = vld [vmem:[%s2530_s5 + $0x8] sm:$0xff] }
 0x1ca   : > { %778 = vperm.xlu1 %1698, %v2287_v54   ;;  %2549 = vst [vmem:[#allocation9_spill] sm:$0xff] %v2308_v36 }
 0x1cb   : > { %1164 = vperm.xlu0 %1699, %v2296_v56  }
 0x1ce   : > { %768 = vperm.xlu1 %1698, %v2301_v58  }
 0x1cf   : > { %1154 = vperm.xlu0 %1699, %v2308_v36  }
 0x1d2   : > { %763 = vperm.xlu1 %1698, %v2313_v62  }
 0x1d3   : > { %783 = vperm.xlu0 %1699, %v2320_v37  }
 0x278   : > { %v701_v57 = vpop.f32.mrf.mxu1 }
 0x279   : > { %v702_v42 = vadd.f32 %v701_v57, %v609_v48 }
 0x27a   : > { %v703_v59 = vpop.f32.mrf.mxu1 }
 0x27b   : > { %v704_v36 = vadd.f32 %v703_v59, %v609_v48 }
 0x27c   : > { %v707_v60 = vpop.f32.mrf.mxu1 }
 0x27d   : > { %v708_v56 = vadd.f32 %v707_v60, %v614_v39 }
 0x27e   : > { %v709_v63 = vpop.f32.mrf.mxu1 }
 0x27f   : > { %v710_v41 = vadd.f32 %v709_v63, %v614_v39 }
 0x280   : > { %v713_v35 = vpop.f32.mrf.mxu1 }
 0x281   : > { %v714_v47 = vadd.f32 %v713_v35, %v619_v55 }
 0x282   : > { %v715_v38 = vpop.f32.mrf.mxu1 }
 0x283   : > { %v716_v50 = vadd.f32 %v715_v38, %v619_v55 }
 0x284   : > { %v719_v40 = vpop.f32.mrf.mxu1 }
 0x285   : > { %v720_v53 = vadd.f32 %v719_v40, %v624_v61 }
 0x286   : > { %v721_v51 = vpop.f32.mrf.mxu1 }
 0x287   : > { %v722_v49 = vadd.f32 %v721_v51, %v624_v61 }
 0x289   : > { %1716 = vtanh.f32 %v722_v49 }
 0x28a   : > { %1718 = vtanh.f32 %v720_v53 }
 0x28b   : > { %1720 = vtanh.f32 %v716_v50 }
 0x28c   : > { %1722 = vtanh.f32 %v714_v47 }
 0x28d   : > { %1724 = vtanh.f32 %v710_v41  ;;  %v2550_v41 = vmov 0.0  }
 0x28e   : > { %1726 = vtanh.f32 %v708_v56 }
 0x28f   : > { %1728 = vtanh.f32 %v704_v36 }
 0x290   : > { %1730 = vtanh.f32 %v702_v42 }
 0x296   : > { %v1717_v44 = vpop.eup %1716 }
 0x297   : > { %v1719_v33 = vpop.eup %1718  ;;  %828 = vmatprep.subr.mxu1 %v1717_v44 }
 0x298   : > { %v1721_v40 = vpop.eup %1720  ;;  %829 = vmatpush1.msra.mxu1 %v1719_v33 }
 0x299   : > { %v1723_v61 = vpop.eup %1722  ;;  %830 = vmatprep.subr.mxu1 %v1721_v40 }
 0x29a   : > { %v1725_v35 = vpop.eup %1724  ;;  %831 = vmatpush1.msra.mxu1 %v1723_v61 }
 0x29b   : > { %v1727_v63 = vpop.eup %1726  ;;  %832 = vmatprep.subr.mxu1 %v1725_v35 }
 0x29c   : > { %v1729_v60 = vpop.eup %1728  ;;  %833 = vmatpush1.msra.mxu1 %v1727_v63 }
 0x29d   : > { %v1731_v57 = vpop.eup %1730  ;;  %834 = vmatprep.subr.mxu1 %v1729_v60 }
 0x29e   : > { %835 = vmatpush1.msra.mxu1 %v1731_v57 }
 0x29f   : > { %1511 = vmatmul.mubr.msk.f32.vlgmr.msra.gmra.mxu1 %vm626_vm1, %v2242_v46  ;;  %1607 = vmatprep.subr.msk.mxu1 %vm965_vm2, %v1968_v0  ;;  %v2551_v0 = vld [vmem:[#allocation7_spill] sm:$0xff] }
 0x2a0   : > { %1608 = vmatpush3.xpose.msk.msra.mxu1 %vm965_vm2, %v1978_v2  ;;  %874 = vmatprep.mubr.f32.mxu1 %v2550_v41  ;;  %v2553_v2 = vld [vmem:[#allocation6_spill] sm:$0xff] }
 0x2a1   : > { %1609 = vmatprep.subr.msk.mxu1 %vm965_vm2, %v1971_v1  ;;  %v2552_v1 = vld [vmem:[#allocation5_spill] sm:$0xff] }
 0x2a3   : > { %1512 = vmatmul.mubr.msk.f32.gmra.mxu1 %vm626_vm1, %v2227_v43 }
 0x2a4   : > { %1610 = vmatpush3.xpose.msk.msra.mxu1 %vm965_vm2, %v1981_v3  ;;  %880 = vmatprep.mubr.f32.mxu1 %v2550_v41  ;;  %v2432_v3 = vld [vmem:[%s2530_s5 + $0x10] sm:$0xff] }
 0x2a5   : > { %1611 = vmatprep.subr.msk.mxu1 %vm965_vm2, %v1988_v4  ;;  %1159 = vperm.xlu1 %1698, %v2432_v3   ;;  %v2438_v4 = vld [vmem:[%s2530_s5] sm:$0xff] }
 0x2a7   : > { %1513 = vmatmul.mubr.msk.f32.gmra.mxu1 %vm626_vm1, %v2236_v45 }
 0x2a8   : > { %1612 = vmatpush3.xpose.msk.msra.mxu1 %vm965_vm2, %v1991_v5  ;;  %886 = vmatprep.mubr.f32.mxu1 %v2550_v41  ;;  %v2444_v5 = vld [vmem:[%s2531_s6] sm:$0x1] }
 0x2a9   : > { %1613 = vmatprep.subr.msk.mxu1 %vm965_vm2, %v1998_v6  ;;  %1149 = vperm.xlu1 %1698, %v2438_v4  }
 0x2ab   : > { %1514 = vmatmul.mubr.msk.f32.gmra.mxu1 %vm626_vm1, %v2218_v34 }
 0x2ac   : > { %1614 = vmatpush3.xpose.msk.msra.mxu1 %vm965_vm2, %v2001_v7  ;;  %892 = vmatprep.mubr.f32.mxu1 %v2550_v41 }
 0x2ad   : > { %1615 = vmatprep.subr.msk.mxu1 %vm965_vm2, %v2008_v8  ;;  %1283 = vperm.xlu1 %1698, %v2444_v5  }
 0x2af   : > { %1515 = vmatmul.mubr.msk.f32.gmra.mxu1 %vm626_vm1, %v2313_v62 }
 0x2b0   : > { %1616 = vmatpush3.xpose.msk.msra.mxu1 %vm965_vm2, %v2011_v9  ;;  %898 = vmatprep.mubr.f32.mxu1 %v2550_v41 }
 0x2b1   : > { %1617 = vmatprep.subr.msk.mxu1 %vm965_vm2, %v2018_v10 }
 0x2b3   : > { %1516 = vmatmul.mubr.msk.f32.gmra.mxu1 %vm626_vm1, %v2301_v58 }
 0x2b4   : > { %1618 = vmatpush3.xpose.msk.msra.mxu1 %vm965_vm2, %v2021_v11  ;;  %904 = vmatprep.mubr.f32.mxu1 %v2550_v41 }
 0x2b5   : > { %1619 = vmatprep.subr.msk.mxu1 %vm965_vm2, %v2028_v12 }
 0x2b7   : > { %1517 = vmatmul.mubr.msk.f32.gmra.mxu1 %vm626_vm1, %v2282_v52 }
 0x2b8   : > { %1620 = vmatpush3.xpose.msk.msra.mxu1 %vm965_vm2, %v2031_v13  ;;  %910 = vmatprep.mubr.f32.mxu1 %v2550_v41 }
 0x2b9   : > { %1621 = vmatprep.subr.msk.mxu1 %vm965_vm2, %v2038_v14 }
 0x2bb   : > { %1518 = vmatmul.mubr.msk.f32.gmra.mxu1 %vm626_vm1, %v2287_v54 }
 0x2bc   : > { %1622 = vmatpush3.xpose.msk.msra.mxu1 %vm965_vm2, %v2041_v15  ;;  %916 = vmatprep.mubr.f32.mxu1 %v2550_v41 }
 0x2bd   : > { %1623 = vmatprep.subr.msk.mxu1 %vm965_vm2, %v2048_v16 }
 0x2bf   : > { %1519 = vmatmul.mubr.msk.f32.gmra.mxu1 %vm626_vm1, %v2320_v37 }
 0x2c0   : > { %1624 = vmatpush3.xpose.msk.msra.mxu1 %vm965_vm2, %v2051_v17  ;;  %1639 = vmatprep.mubr.msk.f32.mxu1 %vm965_vm2, %v2270_v28 }
 0x2c1   : > { %1625 = vmatprep.subr.msk.mxu1 %vm965_vm2, %v2058_v18 }
 0x2c4   : > { %1626 = vmatpush3.xpose.msk.msra.mxu1 %vm965_vm2, %v2061_v19 }
 0x2c5   : > { %1627 = vmatprep.subr.msk.mxu1 %vm965_vm2, %v2068_v20 }
 0x2c8   : > { %1628 = vmatpush3.xpose.msk.msra.mxu1 %vm965_vm2, %v2071_v21 }
 0x2c9   : > { %1629 = vmatprep.subr.msk.mxu1 %vm965_vm2, %v2078_v22  ;;  %v759_v22 = vpop.permute.xlu0 %758 }
 0x2cc   : > { %1630 = vmatpush3.xpose.msk.msra.mxu1 %vm965_vm2, %v2081_v23 }
 0x2cd   : > { %1631 = vmatprep.subr.msk.mxu1 %vm965_vm2, %v2088_v24  ;;  %v754_v24 = vpop.permute.xlu1 %753 }
 0x2d0   : > { %1632 = vmatpush3.xpose.msk.msra.mxu1 %vm965_vm2, %v2091_v25 }
 0x2d1   : > { %1633 = vmatprep.subr.msk.mxu1 %vm965_vm2, %v2098_v26  ;;  %v744_v43 = vpop.permute.xlu1 %743 }
 0x2d4   : > { %1634 = vmatpush3.xpose.msk.msra.mxu1 %vm965_vm2, %v2101_v27 }
 0x2d5   : > { %1635 = vmatprep.subr.msk.mxu1 %vm965_vm2, %v2113_v29  ;;  %v958_v52 = vpop.permute.xlu1 %957 }
 0x2d8   : > { %1636 = vmatpush3.xpose.msk.msra.mxu1 %vm965_vm2, %v2116_v30  ;;  %v749_v30 = vpop.permute.xlu0 %748 }
 0x2d9   : > { %1637 = vmatprep.subr.msk.mxu1 %vm965_vm2, %v2125_v31  ;;  %v953_v38 = vpop.permute.xlu1 %952 }
 0x2dc   : > { %1638 = vmatpush3.xpose.msk.msra.mxu1 %vm965_vm2, %v2128_v32  ;;  %v963_v56 = vpop.permute.xlu0 %962 }
 0x2df   : > { %1640 = vmatmul.mubr.msk.f32.vlgmr.msra.gmra.mxu1 %vm965_vm2, %v2270_v28 }
 0x2e0   : > { %1641 = vmatprep.mubr.msk.f32.mxu1 %vm965_vm2, %v2551_v0  ;;  %v948_v47 = vpop.permute.xlu0 %947 }
 0x2e3   : > { %1642 = vmatmul.mubr.msk.f32.gmra.mxu1 %vm965_vm2, %v2551_v0 }
 0x2e4   : > { %1643 = vmatprep.mubr.msk.f32.mxu1 %vm965_vm2, %v2552_v1 }
 0x2e7   : > { %1644 = vmatmul.mubr.msk.f32.gmra.mxu1 %vm965_vm2, %v2552_v1 }
 0x2e8   : > { %1645 = vmatprep.mubr.msk.f32.mxu1 %vm965_vm2, %v2553_v2 }
 0x2eb   : > { %1646 = vmatmul.mubr.msk.f32.gmra.mxu1 %vm965_vm2, %v2553_v2 }
 0x35f   : > { %v870_v6 = vpop.f32.mrf.mxu1 }
 0x360   : > { %v871_v42 = vadd.f32 %v870_v6, %v744_v43 }
 0x361   : > { %v872_v7 = vpop.f32.mrf.mxu1 }
 0x362   : > { %v873_v44 = vadd.f32 %v872_v7, %v744_v43 }
 0x363   : > { %v876_v8 = vpop.f32.mrf.mxu1 }
 0x364   : > { %v877_v45 = vadd.f32 %v876_v8, %v749_v30 }
 0x365   : > { %v878_v9 = vpop.f32.mrf.mxu1 }
 0x366   : > { %v879_v34 = vadd.f32 %v878_v9, %v749_v30 }
 0x367   : > { %v882_v10 = vpop.f32.mrf.mxu1 }
 0x368   : > { %v883_v31 = vadd.f32 %v882_v10, %v754_v24 }
 0x369   : > { %v884_v11 = vpop.f32.mrf.mxu1 }
 0x36a   : > { %v885_v25 = vadd.f32 %v884_v11, %v754_v24 }
 0x36b   : > { %v888_v12 = vpop.f32.mrf.mxu1 }
 0x36c   : > { %v889_v26 = vadd.f32 %v888_v12, %v759_v22  ;;  %1732 = vtanh.f32 %v885_v25 }
 0x36d   : > { %v890_v13 = vpop.f32.mrf.mxu1 }
 0x36e   : > { %v891_v29 = vadd.f32 %v890_v13, %v759_v22  ;;  %1734 = vtanh.f32 %v889_v26 }
 0x36f   : > { %v2447_v14 = vpop.f32.mrf.mxu1 }
 0x370   : > { %1736 = vtanh.f32 %v891_v29 }
 0x371   : > { %v2449_v15 = vpop.f32.mrf.mxu1  ;;  %1738 = vtanh.f32 %v883_v31  ;;  %v2554_v31 = vld [vmem:[#allocation9_spill] sm:$0xff] }
 0x372   : > { %1740 = vtanh.f32 %v879_v34  ;;  %v779_v34 = vpop.permute.xlu1 %778 }
 0x373   : > { %v2451_v16 = vpop.f32.mrf.mxu1  ;;  %1742 = vtanh.f32 %v877_v45 }
 0x374   : > { %1744 = vtanh.f32 %v873_v44 }
 0x375   : > { %v2453_v17 = vpop.f32.mrf.mxu1  ;;  %1746 = vtanh.f32 %v871_v42 }
 0x376   : > { %v769_v43 = vpop.permute.xlu1 %768 }
 0x377   : > { %v2455_v18 = vpop.f32.mrf.mxu1 }
 0x379   : > { %v2457_v19 = vpop.f32.mrf.mxu1  ;;  %v1733_v37 = vpop.eup %1732 }
 0x37a   : > { %v764_v42 = vpop.permute.xlu1 %763 }
 0x37b   : > { %v2459_v20 = vpop.f32.mrf.mxu1  ;;  %v1735_v53 = vpop.eup %1734 }
 0x37d   : > { %v2461_v21 = vpop.f32.mrf.mxu1  ;;  %v1737_v49 = vpop.eup %1736 }
 0x37e   : > { %v1739_v61 = vpop.eup %1738  ;;  %v915_v44 = vadd.f32 %v2461_v21, %v779_v34 }
 0x37f   : > { %v2463_v23 = vpop.f32.mrf.mxu1  ;;  %v1741_v57 = vpop.eup %1740 }
 0x380   : > { %v1743_v2 = vpop.eup %1742 }
 0x381   : > { %v2465_v27 = vpop.f32.mrf.mxu1  ;;  %v1745_v7 = vpop.eup %1744 }
 0x382   : > { %v1747_v9 = vpop.eup %1746 }
 0x39f   : > { %v1104_v32 = vpop.f32.mrf.mxu1 }
 0x3a0   : > { %v1105_v0 = vadd.f32 %v1104_v32, %v948_v47  ;;  %v2555_v32 = vld [vmem:[#allocation8_spill] sm:$0xff] }
 0x3a1   : > { %v1106_v46 = vpop.f32.mrf.mxu1 }
 0x3a2   : > { %v1107_v35 = vadd.f32 %v1106_v46, %v948_v47  ;;  %v1127_v11 = vmul.f32 %v1747_v9, %v1105_v0  ;;  %v913_v46 = vadd.f32 %v2459_v20, %v779_v34 }
 0x3a3   : > { %v1110_v28 = vpop.f32.mrf.mxu1 }
 0x3a4   : > { %v1111_v48 = vadd.f32 %v1110_v28, %v953_v38  ;;  %v1128_v10 = vmul.f32 %v1745_v7, %v1107_v35 }
 0x3a5   : > { %v1112_v33 = vpop.f32.mrf.mxu1 }
 0x3a6   : > { %v1113_v51 = vadd.f32 %v1112_v33, %v953_v38  ;;  %v1129_v8 = vmul.f32 %v1743_v2, %v1111_v48  ;;  %v903_v33 = vadd.f32 %v2453_v17, %v769_v43  ;;  %v1160_v17 = vpop.permute.xlu1 %1159 }
 0x3a7   : > { %v1116_v54 = vpop.f32.mrf.mxu1 }
 0x3a8   : > { %v1117_v39 = vadd.f32 %v1116_v54, %v958_v52  ;;  %v1130_v6 = vmul.f32 %v1741_v57, %v1113_v51  ;;  %v897_v54 = vadd.f32 %v2449_v15, %v764_v42 }
 0x3a9   : > { %v1118_v58 = vpop.f32.mrf.mxu1 }
 0x3aa   : > { %v1119_v36 = vadd.f32 %v1118_v58, %v958_v52  ;;  %v1131_v1 = vmul.f32 %v1739_v61, %v1117_v39  ;;  %v901_v52 = vadd.f32 %v2451_v16, %v769_v43  ;;  %v1150_v51 = vpop.permute.xlu1 %1149 }
 0x3ab   : > { %v1122_v59 = vpop.f32.mrf.mxu1 }
 0x3ac   : > { %v1123_v62 = vadd.f32 %v1122_v59, %v963_v56  ;;  %v1132_v63 = vmul.f32 %v1733_v37, %v1119_v36 }
 0x3ad   : > { %v1124_v55 = vpop.f32.mrf.mxu1 }
 0x3ae   : > { %v1125_v50 = vadd.f32 %v1124_v55, %v963_v56  ;;  %v1133_v40 = vmul.f32 %v1735_v53, %v1123_v62  ;;  %v1284_v43 = vpop.permute.xlu1 %1283 }
 0x3b0   : > { %v1134_v60 = vmul.f32 %v1737_v49, %v1125_v50 }
 0x3b2   : > { %1748 = vtanh.f32 %v1134_v60 }
 0x3b3   : > { %1750 = vtanh.f32 %v1133_v40 }
 0x3b4   : > { %1752 = vtanh.f32 %v1132_v63 }
 0x3b5   : > { %1754 = vtanh.f32 %v1131_v1 }
 0x3b6   : > { %1756 = vtanh.f32 %v1130_v6 }
 0x3b7   : > { %1758 = vtanh.f32 %v1129_v8 }
 0x3b8   : > { %1760 = vtanh.f32 %v1128_v10 }
 0x3b9   : > { %1762 = vtanh.f32 %v1127_v11 }
 0x3bf   : > { %v1749_v12 = vpop.eup %1748 }
 0x3c0   : > { %v1751_v13 = vpop.eup %1750  ;;  %1199 = vmatprep.subr.mxu0 %v1749_v12 }
 0x3c1   : > { %v1753_v22 = vpop.eup %1752  ;;  %1200 = vmatpush1.msra.mxu0 %v1751_v13 }
 0x3c2   : > { %v1755_v24 = vpop.eup %1754  ;;  %1201 = vmatprep.subr.mxu0 %v1753_v22 }
 0x3c3   : > { %v1757_v25 = vpop.eup %1756  ;;  %1202 = vmatpush1.msra.mxu0 %v1755_v24 }
 0x3c4   : > { %v1759_v26 = vpop.eup %1758  ;;  %1203 = vmatprep.subr.mxu0 %v1757_v25 }
 0x3c5   : > { %v1761_v29 = vpop.eup %1760  ;;  %1204 = vmatpush1.msra.mxu0 %v1759_v26 }
 0x3c6   : > { %v1763_v30 = vpop.eup %1762  ;;  %1205 = vmatprep.subr.mxu0 %v1761_v29 }
 0x3c7   : > { %1206 = vmatpush1.msra.mxu0 %v1763_v30 }
 0x3c8   : > { %1556 = vmatmul.mubr.msk.f32.vlgmr.msra.gmra.mxu0 %vm626_vm1, %v2438_v4  ;;  %v774_v4 = vpop.permute.xlu0 %773 }
 0x3c9   : > { %1245 = vmatprep.mubr.f32.mxu0 %v2550_v41  ;;  %v909_v45 = vadd.f32 %v2457_v19, %v774_v4  ;;  %v907_v28 = vadd.f32 %v2455_v18, %v774_v4  ;;  %v895_v19 = vadd.f32 %v2447_v14, %v764_v42 }
 0x3cb   : > { %1764 = vtanh.f32 %v909_v45 }
 0x3cc   : > { %1557 = vmatmul.mubr.msk.f32.gmra.mxu0 %vm626_vm1, %v2554_v31  ;;  %1766 = vtanh.f32 %v913_v46  ;;  %v1165_v18 = vpop.permute.xlu0 %1164  ;;  %v1286_v31 = vlaneseq }
 0x3cd   : > { %1251 = vmatprep.mubr.f32.mxu0 %v2550_v41  ;;  %1768 = vtanh.f32 %v915_v44 }
 0x3ce   : > { %1770 = vtanh.f32 %v907_v28  ;;  %vm1387_vm3 = vcmp.lt.s32.totalorder %v1286_v31, 256 }
 0x3cf   : > { %1772 = vtanh.f32 %v903_v33 }
 0x3d0   : > { %1558 = vmatmul.mubr.msk.f32.gmra.mxu0 %vm626_vm1, %v2432_v3  ;;  %1774 = vtanh.f32 %v901_v52  ;;  %v1155_v37 = vpop.permute.xlu0 %1154 }
 0x3d1   : > { %1257 = vmatprep.mubr.f32.mxu0 %v2550_v41  ;;  %1776 = vtanh.f32 %v897_v54 }
 0x3d2   : > { %1778 = vtanh.f32 %v895_v19 }
 0x3d4   : > { %1559 = vmatmul.mubr.msk.f32.gmra.mxu0 %vm626_vm1, %v2555_v32  ;;  %v784_v26 = vpop.permute.xlu0 %783  ;;  %v1287_v32 = vshrl.u32 %v1286_v31, 7 }
 0x3d5   : > { %1356 = vmatprep.mubr.f32.mxu0 %v2550_v41  ;;  %v919_v29 = vadd.f32 %v2463_v23, %v784_v26  ;;  %v921_v30 = vadd.f32 %v2465_v27, %v784_v26  ;;  %v1871_v23 = vmov 1966171168  }
 0x3d6   : > { %v1288_v34 = vsub.s32 0, %v1287_v32  ;;  %v1371_v27 = vunpack.c.l.s4 %v1871_v23 }
 0x3d8   : > { %v1765_v62 = vpop.eup %1764  ;;  %v1289_v4 = vrot.slane %v1284_v43, %v1288_v34  ;;  %v1372_v52 = vunpack.c.0.s8 %v1371_v27 }
 0x3d9   : > { %v1767_v39 = vpop.eup %1766 }
 0x3da   : > { %v1769_v53 = vpop.eup %1768  ;;  %v1375_v54 = vsub.s32 %v1372_v52, %v1287_v32 }
 0x3db   : > { %v1771_v47 = vpop.eup %1770 }
 0x3dc   : > { %v1773_v35 = vpop.eup %1772 }
 0x3dd   : > { %v1775_v57 = vpop.eup %1774 }
 0x3de   : > { %v1777_v1 = vpop.eup %1776 }
 0x3df   : > { %v1779_v6 = vpop.eup %1778 }
 0x488   : > { %v1241_v3 = vpop.f32.mrf.mxu0 }
 0x489   : > { %v1242_v63 = vadd.f32 %v1241_v3, %v1150_v51 }
 0x48a   : > { %v1243_v41 = vpop.f32.mrf.mxu0 }
 0x48b   : > { %v1244_v48 = vadd.f32 %v1243_v41, %v1150_v51  ;;  %v1264_v8 = vmul.f32 %v1779_v6, %v1242_v63 }
 0x48c   : > { %v1247_v20 = vpop.f32.mrf.mxu0 }
 0x48d   : > { %v1248_v50 = vadd.f32 %v1247_v20, %v1155_v37  ;;  %v1265_v7 = vmul.f32 %v1777_v1, %v1244_v48 }
 0x48e   : > { %v1249_v21 = vpop.f32.mrf.mxu0 }
 0x48f   : > { %v1250_v14 = vadd.f32 %v1249_v21, %v1155_v37  ;;  %v1266_v2 = vmul.f32 %v1775_v57, %v1248_v50 }
 0x490   : > { %v1253_v56 = vpop.f32.mrf.mxu0 }
 0x491   : > { %v1254_v15 = vadd.f32 %v1253_v56, %v1160_v17  ;;  %v1267_v0 = vmul.f32 %v1773_v35, %v1250_v14 }
 0x492   : > { %v1255_v58 = vpop.f32.mrf.mxu0 }
 0x493   : > { %v1256_v16 = vadd.f32 %v1255_v58, %v1160_v17  ;;  %v1268_v60 = vmul.f32 %v1771_v47, %v1254_v15 }
 0x494   : > { %v1259_v59 = vpop.f32.mrf.mxu0 }
 0x495   : > { %v1260_v36 = vadd.f32 %v1259_v59, %v1165_v18  ;;  %v1269_v40 = vmul.f32 %v1765_v62, %v1256_v16 }
 0x496   : > { %v1261_v38 = vpop.f32.mrf.mxu0 }
 0x497   : > { %v1262_v55 = vadd.f32 %v1261_v38, %v1165_v18  ;;  %v1270_v49 = vmul.f32 %v1767_v39, %v1260_v36 }
 0x499   : > { %v1271_v61 = vmul.f32 %v1769_v53, %v1262_v55 }
 0x49b   : > { %1780 = vtanh.f32 %v1271_v61 }
 0x49c   : > { %1782 = vtanh.f32 %v1270_v49 }
 0x49d   : > { %1784 = vtanh.f32 %v1269_v40 }
 0x49e   : > { %1786 = vtanh.f32 %v1268_v60 }
 0x49f   : > { %1788 = vtanh.f32 %v1267_v0 }
 0x4a0   : > { %1790 = vtanh.f32 %v1266_v2 }
 0x4a1   : > { %1792 = vtanh.f32 %v1265_v7 }
 0x4a2   : > { %1794 = vtanh.f32 %v1264_v8 }
 0x4a3   : > { %1796 = vtanh.f32 %v919_v29 }
 0x4a4   : > { %1798 = vtanh.f32 %v921_v30 }
 0x4a8   : > { %v1781_v9 = vpop.eup %1780 }
 0x4a9   : > { %v1783_v10 = vpop.eup %1782  ;;  %1316 = vmatprep.subr.mxu0 %v1781_v9 }
 0x4aa   : > { %v1785_v11 = vpop.eup %1784  ;;  %1317 = vmatpush1.msra.mxu0 %v1783_v10 }
 0x4ab   : > { %v1787_v12 = vpop.eup %1786  ;;  %1318 = vmatprep.subr.mxu0 %v1785_v11 }
 0x4ac   : > { %v1789_v13 = vpop.eup %1788  ;;  %1319 = vmatpush1.msra.mxu0 %v1787_v12 }
 0x4ad   : > { %v1791_v22 = vpop.eup %1790  ;;  %1320 = vmatprep.subr.mxu0 %v1789_v13 }
 0x4ae   : > { %v1793_v24 = vpop.eup %1792  ;;  %1321 = vmatpush1.msra.mxu0 %v1791_v22 }
 0x4af   : > { %v1795_v25 = vpop.eup %1794  ;;  %1322 = vmatprep.subr.mxu0 %v1793_v24 }
 0x4b0   : > { %1323 = vmatpush1.msra.mxu0 %v1795_v25  ;;  %v1797_v44 = vpop.eup %1796 }
 0x4b1   : > { %1560 = vmatmul.mubr.msk.f32.vlgmr.msra.gmra.mxu0 %vm626_vm1, %v2444_v5  ;;  %v1799_v5 = vpop.eup %1798 }
 0x571   : > { %v1358_v45 = vpop.f32.mrf.mxu0 }
 0x572   : > { %v1359_v46 = vadd.f32 %v1358_v45, %v1289_v4 }
 0x573   : > { %v1360_v42 = vpop.f32.mrf.mxu0 }
 0x574   : > { %v1363_v28 = vmul.f32 %v1797_v44, %v1359_v46  ;;  %v1361_v3 = vadd.f32 %v1360_v42, %v1289_v4 }
 0x576   : > { %v1364_v33 = vmul.f32 %v1799_v5, %v1361_v3  ;;  %1800 = vtanh.f32 %v1363_v28 }
 0x578   : > { %1802 = vtanh.f32 %v1364_v33 }
 0x583   : > { %v1801_v41 = vpop.eup %1800 }
 0x585   : > { %v1803_v19 = vpop.eup %1802 }
 0x586   : > { %v1369_v20 = vcombine.low %v1801_v41, %v1803_v19 }
 0x588   : > { %v1376_v21 = vrot.slane %v1369_v20, %v1375_v54 }
 0x58a   : > { %v1383_v18 = vrot.slane %v1376_v21, %v1375_v54 }
 0x58c   : > { %1389 = vst.msk [vmem:[%s272_s18] sm:$0x3] %vm1387_vm3, %v1383_v18 }
 0x58d   : > { %1817 = shalt.err (!%p1814_p3)
}
 0x58e   : > { %s1818_s14 = scalar_lea.hbm %s1403_s22, 32  ;;  %s1822_s16 = scalar_lea.hbm %s2532_s7, 64 }
 0x58f   : > { %p1819_p4 = scmp.ne.s32.totalorder %s1403_s22, %s1818_s14  ;;  %p1823_p9 = scmp.lt.s32.totalorder %s1403_s22, %s2532_s7 }
 0x590   : > { %p1824_p10 = scmp.lt.s32.totalorder %s1822_s16, %s1818_s14 }
 0x591   : > { %p1820_p7 = pnand %p1819_p4, %p1948_p5 }
 0x592   : > { %p1825_p11 = por %p1824_p10, %p1823_p9 }
 0x593   : > { %p1821_p8 = pneg %p1820_p7 }
 0x595   : > { %p1826_p12 = pnand %p1825_p11, %p1821_p8 }
 0x597   : > { %1829 = shalt.err (!%p1826_p12)
}
 0x598   : > { %1647 = dma.vmem_to_hbm [thread:$0]  (%p1948_p5), %s1406_s19, 32, %s1403_s22, %s1391_s23  }
 0x599 PF: > { %p1653_p13 = scmp.ge.s32.totalorder %s1864_s27, 2  ;;  %s1417_s20 = sand.u32 1, %s1852_s24  }
 0x59a   : > { %s1418_s21 = scalar_lea.sflag [#allocation3], %s1417_s20 }
 0x59b   : > { %p1650_p0 = pnand %p1653_p13, %p1952_p6 }
 0x59d   : > { %p1651_p1 = pneg %p1650_p0 }
 0x59f   : > { %1847 = dma.done.wait (%p1651_p1), %s1418_s21, 32  }
 0x5a0   : > { %1849 = vsyncadd (%p1651_p1), %s1418_s21, 4294967264  ;;  %p17_p2 = scmp.ge.s32.totalorder %s1936_s30, 4   ;;  %s2556_s24 = smov %s1856_s25 }
 0x5a1   : > { %s2557_s25 = smov %s1860_s26  ;;  %s2558_s26 = smov %s1946_s10 }
 0x5a2   : > { %s2559_s27 = smov %s1936_s30  ;;  %19 = sbr.rel (!%p17_p2) target bundleno = 3 (0x3), region = 83 }
 0x5a7   :  { %1423 = vsyncpa [#allocation3], 1 }
 0x5a8   :  { %1425 = vsyncpa [#allocation3 + $0x1], 1 }

</bundles_post_ra>
